<compile_context>
chip_gen: v7x
topology: tpu7x:2x2x1
jax: 0.10.0
libtpu: 0.0.40
codegen_flags: <defaults>
</compile_context>

<pallas_src>
import functools

import jax
import jax.numpy as jnp
from jax.experimental import pallas as pl
from jax.experimental.pallas import tpu as pltpu

BN_EPS = 1e-5


def mlp_kernel(x_ref, w_ref, o_ref):
    """Single-block forward pass; everything VMEM resident.

    x_ref: (B, D_in) f32
    w_ref: (3, H, H) bf16 zero-padded weight+param slab:
             slice 0: rows [:D_in]        = W0 (in -> hidden)
                      row  [D_in + 0]     = gamma0
                      row  [D_in + 1]     = beta0
                      row  [D_in + 2]     = gamma1
                      row  [D_in + 3]     = beta1
                      row  [D_in + 4]     = output bias (lane-padded to H)
             slice 1: W1 (hidden -> hidden)
             slice 2: W2 (hidden -> out), lane-padded to H columns
    o_ref: (B, D_out) f32
    """
    d_in = x_ref.shape[1]
    d_out = o_ref.shape[1]

    # One load of the first HxH slice; slice weights and packed 1xH params
    # from it in registers (d_in is a multiple of the bf16 sublane pack of 16,
    # so both slices are aligned).
    slab0 = w_ref[0]                                    # (H, H) bf16
    w0 = slab0[:d_in, :]                                # (D_in, H) bf16
    p = slab0[d_in:d_in + 8, :].astype(jnp.float32)     # aligned (8, H) tile
    g0, be0, g1, be1, b2 = p[0:1], p[1:2], p[2:3], p[3:4], p[4:5]

    def hidden_block(h_bf16, w_bf16, gamma, beta):
        # Linear (bf16 x bf16 -> f32 accumulate on the MXU).  Pre-BN bias
        # intentionally omitted: it cancels exactly in (h - mean) under
        # batch-statistics BatchNorm1d.
        h = jnp.dot(h_bf16, w_bf16, preferred_element_type=jnp.float32)
        # BatchNorm1d (batch stats, biased variance, eps=1e-5), affine folded
        # into a single multiply-add.  E[h^2]-E[h]^2 keeps the two cross-
        # sublane reductions independent; it can cancel catastrophically if
        # |mean| >> std (not the case for this init), hence the clamp.
        mean = jnp.mean(h, axis=0, keepdims=True)
        mean_sq = jnp.mean(h * h, axis=0, keepdims=True)
        var = jnp.maximum(mean_sq - mean * mean, 0.0)
        scale = gamma * jax.lax.rsqrt(var + BN_EPS)
        shift = beta - mean * scale
        # act = ReLU; dropout p=0 -> identity.
        return jnp.maximum(h * scale + shift, 0.0)

    h = hidden_block(x_ref[...].astype(jnp.bfloat16), w0, g0, be0)
    h = hidden_block(h.astype(jnp.bfloat16), w_ref[1], g1, be1)

    # Final Linear (real bias) + Sigmoid.  w_ref[2] is lane-padded to H; slice
    # back to d_out before the transcendental + store.
    y = jnp.dot(h.astype(jnp.bfloat16), w_ref[2],
                preferred_element_type=jnp.float32) + b2
    y = y[:, :d_out]
    # exp lands on the EUP; exact reciprocal keeps parity with the reference.
    o_ref[...] = 1.0 / (1.0 + jnp.exp(-y))


@functools.partial(jax.jit, static_argnames=("d_out",))
def solution_model_forward(x, w_slab, *, d_out):
    B, d_in = x.shape
    H = w_slab.shape[1]
    vmem = pl.BlockSpec(memory_space=pltpu.MemorySpace.VMEM)
    cost = pl.CostEstimate(
        flops=2 * B * (d_in * H + H * H + H * d_out),
        transcendentals=B * d_out + 2 * H,
        bytes_accessed=(x.size * x.dtype.itemsize
                        + w_slab.size * w_slab.dtype.itemsize
                        + B * d_out * 4),
    )
    return pl.pallas_call(
        mlp_kernel,
        out_shape=jax.ShapeDtypeStruct((B, d_out), jnp.float32),
        in_specs=[vmem, vmem],
        out_specs=vmem,
        cost_estimate=cost,
    )(x, w_slab)


def init_params(key, input_size, hidden_size, output_size):
    """Parameter init mirroring weight_initialization='normal' (PyTorch-style)."""
    keys = jax.random.split(key, 6)

    def linear(kw, kb, fan_in, fan_out):
        # 'normal': N(0, sqrt(1/in_features)); bias ~ U(-1/sqrt(in), 1/sqrt(in))
        w = jax.random.normal(kw, (fan_in, fan_out), jnp.float32) * jnp.sqrt(1.0 / fan_in)
        bound = 1.0 / jnp.sqrt(float(fan_in))
        b = jax.random.uniform(kb, (1, fan_out), jnp.float32, -bound, bound)
        return w, b

    w0, b0 = linear(keys[0], keys[1], input_size, hidden_size)
    w1, b1 = linear(keys[2], keys[3], hidden_size, hidden_size)
    w2, b2 = linear(keys[4], keys[5], hidden_size, output_size)
    # BatchNorm affine params (PyTorch default: gamma=1, beta=0)
    g0 = jnp.ones((1, hidden_size), jnp.float32)
    be0 = jnp.zeros((1, hidden_size), jnp.float32)
    g1 = jnp.ones((1, hidden_size), jnp.float32)
    be1 = jnp.zeros((1, hidden_size), jnp.float32)
    return (w0, b0, g0, be0, w1, b1, g1, be1, w2, b2)


def pack_params(params):
    """Pack 10 per-layer tensors into ONE bf16 kernel operand (off the hot path).

    The 1xH params live in the zero rows d_in..d_in+4 of the first HxH slice,
    so the kernel needs only two operands total (x, slab).  b0/b1 are
    deliberately NOT packed: a bias added before a batch-stat BatchNorm is a
    mathematical no-op in this forward pass.
    """
    (w0, _b0, g0, be0, w1, _b1, g1, be1, w2, b2) = params
    d_in, H = w0.shape
    d_out = w2.shape[1]
    assert d_in + 5 <= H, "param rows must fit in the zero padding of slice 0"

    slab0 = jnp.zeros((H, H), jnp.float32)
    slab0 = slab0.at[:d_in, :].set(w0)
    slab0 = slab0.at[d_in + 0, :].set(g0[0])
    slab0 = slab0.at[d_in + 1, :].set(be0[0])
    slab0 = slab0.at[d_in + 2, :].set(g1[0])
    slab0 = slab0.at[d_in + 3, :].set(be1[0])
    slab0 = slab0.at[d_in + 4, :d_out].set(b2[0])
    slab2 = jnp.zeros((H, H), jnp.float32).at[:, :d_out].set(w2)
    # bf16: native MXU dtype on v6e/v7x, halves the weight-slab DMA bytes.
    return jnp.stack([slab0, w1, slab2], axis=0).astype(jnp.bfloat16)  # (3,H,H)


def reference_forward(x, params):
    """Pure-JAX f32 reference, faithful to the PyTorch module (incl. b0/b1)."""
    (w0, b0, g0, be0, w1, b1, g1, be1, w2, b2) = params

    def block(h, w, b, g, beta):
        h = h @ w + b
        mean = jnp.mean(h, axis=0, keepdims=True)
        var = jnp.mean((h - mean) ** 2, axis=0, keepdims=True)
        h = (h - mean) / jnp.sqrt(var + BN_EPS) * g + beta
        return jnp.maximum(h, 0.0)

    h = block(x, w0, b0, g0, be0)
    h = block(h, w1, b1, g1, be1)
    return jax.nn.sigmoid(h @ w2 + b2)


if __name__ == "__main__":
    B, D_IN, H, D_OUT = 16, 32, 64, 8

    key = jax.random.PRNGKey(0)
    kx, kp = jax.random.split(key)
    x = jax.random.normal(kx, (B, D_IN), jnp.float32)
    params = init_params(kp, D_IN, H, D_OUT)
    w_slab = pack_params(params)

    out = solution_model_forward(x, w_slab, d_out=D_OUT)
    out = jax.block_until_ready(out)

    ref = reference_forward(x, params)
    assert out.shape == (B, D_OUT)
    # Tolerance loosened vs. the f32 version because the weight slab / matmul
    # inputs are bf16 (f32 accumulation); BN keeps the drift small but > 5e-5.
    assert jnp.allclose(out, ref, atol=2e-2, rtol=2e-2), "mismatch vs reference"

    print("KERNEL_OK")
</pallas_src>

<mosaic_0001>
module attributes {stable_mosaic.version = 11 : i64} {
  func.func @mlp_kernel(%arg0: memref<16x32xf32, #tpu.memory_space<vmem>>, %arg1: memref<3x64x64xbf16, #tpu.memory_space<vmem>>, %arg2: memref<16x8xf32, #tpu.memory_space<vmem>>) attributes {dimension_semantics = [], scalar_prefetch = 0 : i64, scratch_operands = 0 : i64, tpu.core_type = #tpu.core_type<tc>} {
    %c0 = arith.constant 0 : index
    %c0_0 = arith.constant 0 : index
    %c0_1 = arith.constant 0 : index
    %0 = vector.load %arg1[%c0, %c0_0, %c0_1] : memref<3x64x64xbf16, #tpu.memory_space<vmem>>, vector<1x64x64xbf16>
    %1 = vector.shape_cast %0 : vector<1x64x64xbf16> to vector<64x64xbf16>
    %2 = vector.extract_strided_slice %1 {offsets = [0, 0], sizes = [32, 64], strides = [1, 1]} : vector<64x64xbf16> to vector<32x64xbf16>
    %3 = vector.extract_strided_slice %1 {offsets = [32, 0], sizes = [8, 64], strides = [1, 1]} : vector<64x64xbf16> to vector<8x64xbf16>
    %4 = arith.extf %3 : vector<8x64xbf16> to vector<8x64xf32>
    %5 = vector.extract_strided_slice %4 {offsets = [0, 0], sizes = [1, 64], strides = [1, 1]} : vector<8x64xf32> to vector<1x64xf32>
    %6 = vector.extract_strided_slice %4 {offsets = [1, 0], sizes = [1, 64], strides = [1, 1]} : vector<8x64xf32> to vector<1x64xf32>
    %7 = vector.extract_strided_slice %4 {offsets = [2, 0], sizes = [1, 64], strides = [1, 1]} : vector<8x64xf32> to vector<1x64xf32>
    %8 = vector.extract_strided_slice %4 {offsets = [3, 0], sizes = [1, 64], strides = [1, 1]} : vector<8x64xf32> to vector<1x64xf32>
    %9 = vector.extract_strided_slice %4 {offsets = [4, 0], sizes = [1, 64], strides = [1, 1]} : vector<8x64xf32> to vector<1x64xf32>
    %c0_2 = arith.constant 0 : index
    %c0_3 = arith.constant 0 : index
    %10 = vector.load %arg0[%c0_2, %c0_3] : memref<16x32xf32, #tpu.memory_space<vmem>>, vector<16x32xf32>
    %11 = arith.truncf %10 : vector<16x32xf32> to vector<16x32xbf16>
    %cst = arith.constant dense<0.000000e+00> : vector<16x64xf32>
    %12 = tpu.matmul %11, %2, %cst {dimension_numbers = #tpu.dot_dimension_numbers<[1], [0], [0], [1], [0, 0, 1, 1], [], []>} : vector<16x32xbf16>, vector<32x64xbf16>, vector<16x64xf32> -> vector<16x64xf32>
    %cst_4 = arith.constant dense<0.000000e+00> : vector<64xf32>
    %13 = vector.multi_reduction <add>, %12, %cst_4 [0] : vector<16x64xf32> to vector<64xf32>
    %14 = vector.shape_cast %13 : vector<64xf32> to vector<1x64xf32>
    %cst_5 = arith.constant 1.600000e+01 : f32
    %15 = vector.broadcast %cst_5 : f32 to vector<1x64xf32>
    %16 = arith.divf %14, %15 : vector<1x64xf32>
    %17 = arith.mulf %12, %12 : vector<16x64xf32>
    %cst_6 = arith.constant dense<0.000000e+00> : vector<64xf32>
    %18 = vector.multi_reduction <add>, %17, %cst_6 [0] : vector<16x64xf32> to vector<64xf32>
    %19 = vector.shape_cast %18 : vector<64xf32> to vector<1x64xf32>
    %cst_7 = arith.constant 1.600000e+01 : f32
    %20 = vector.broadcast %cst_7 : f32 to vector<1x64xf32>
    %21 = arith.divf %19, %20 : vector<1x64xf32>
    %22 = arith.mulf %16, %16 : vector<1x64xf32>
    %23 = arith.subf %21, %22 : vector<1x64xf32>
    %cst_8 = arith.constant 0.000000e+00 : f32
    %24 = vector.broadcast %cst_8 : f32 to vector<1x64xf32>
    %25 = arith.maximumf %23, %24 : vector<1x64xf32>
    %cst_9 = arith.constant 9.99999974E-6 : f32
    %26 = vector.broadcast %cst_9 : f32 to vector<1x64xf32>
    %27 = arith.addf %25, %26 : vector<1x64xf32>
    %28 = math.rsqrt %27 : vector<1x64xf32>
    %29 = arith.mulf %5, %28 : vector<1x64xf32>
    %30 = arith.mulf %16, %29 : vector<1x64xf32>
    %31 = arith.subf %6, %30 : vector<1x64xf32>
    %32 = vector.broadcast %29 : vector<1x64xf32> to vector<16x64xf32>
    %33 = arith.mulf %12, %32 : vector<16x64xf32>
    %34 = vector.broadcast %31 : vector<1x64xf32> to vector<16x64xf32>
    %35 = arith.addf %33, %34 : vector<16x64xf32>
    %cst_10 = arith.constant 0.000000e+00 : f32
    %36 = vector.broadcast %cst_10 : f32 to vector<16x64xf32>
    %37 = arith.maximumf %35, %36 : vector<16x64xf32>
    %38 = arith.truncf %37 : vector<16x64xf32> to vector<16x64xbf16>
    %c1 = arith.constant 1 : index
    %c0_11 = arith.constant 0 : index
    %c0_12 = arith.constant 0 : index
    %39 = vector.load %arg1[%c1, %c0_11, %c0_12] : memref<3x64x64xbf16, #tpu.memory_space<vmem>>, vector<1x64x64xbf16>
    %40 = vector.shape_cast %39 : vector<1x64x64xbf16> to vector<64x64xbf16>
    %cst_13 = arith.constant dense<0.000000e+00> : vector<16x64xf32>
    %41 = tpu.matmul %38, %40, %cst_13 {dimension_numbers = #tpu.dot_dimension_numbers<[1], [0], [0], [1], [0, 0, 1, 1], [], []>} : vector<16x64xbf16>, vector<64x64xbf16>, vector<16x64xf32> -> vector<16x64xf32>
    %cst_14 = arith.constant dense<0.000000e+00> : vector<64xf32>
    %42 = vector.multi_reduction <add>, %41, %cst_14 [0] : vector<16x64xf32> to vector<64xf32>
    %43 = vector.shape_cast %42 : vector<64xf32> to vector<1x64xf32>
    %cst_15 = arith.constant 1.600000e+01 : f32
    %44 = vector.broadcast %cst_15 : f32 to vector<1x64xf32>
    %45 = arith.divf %43, %44 : vector<1x64xf32>
    %46 = arith.mulf %41, %41 : vector<16x64xf32>
    %cst_16 = arith.constant dense<0.000000e+00> : vector<64xf32>
    %47 = vector.multi_reduction <add>, %46, %cst_16 [0] : vector<16x64xf32> to vector<64xf32>
    %48 = vector.shape_cast %47 : vector<64xf32> to vector<1x64xf32>
    %cst_17 = arith.constant 1.600000e+01 : f32
    %49 = vector.broadcast %cst_17 : f32 to vector<1x64xf32>
    %50 = arith.divf %48, %49 : vector<1x64xf32>
    %51 = arith.mulf %45, %45 : vector<1x64xf32>
    %52 = arith.subf %50, %51 : vector<1x64xf32>
    %cst_18 = arith.constant 0.000000e+00 : f32
    %53 = vector.broadcast %cst_18 : f32 to vector<1x64xf32>
    %54 = arith.maximumf %52, %53 : vector<1x64xf32>
    %cst_19 = arith.constant 9.99999974E-6 : f32
    %55 = vector.broadcast %cst_19 : f32 to vector<1x64xf32>
    %56 = arith.addf %54, %55 : vector<1x64xf32>
    %57 = math.rsqrt %56 : vector<1x64xf32>
    %58 = arith.mulf %7, %57 : vector<1x64xf32>
    %59 = arith.mulf %45, %58 : vector<1x64xf32>
    %60 = arith.subf %8, %59 : vector<1x64xf32>
    %61 = vector.broadcast %58 : vector<1x64xf32> to vector<16x64xf32>
    %62 = arith.mulf %41, %61 : vector<16x64xf32>
    %63 = vector.broadcast %60 : vector<1x64xf32> to vector<16x64xf32>
    %64 = arith.addf %62, %63 : vector<16x64xf32>
    %cst_20 = arith.constant 0.000000e+00 : f32
    %65 = vector.broadcast %cst_20 : f32 to vector<16x64xf32>
    %66 = arith.maximumf %64, %65 : vector<16x64xf32>
    %67 = arith.truncf %66 : vector<16x64xf32> to vector<16x64xbf16>
    %c2 = arith.constant 2 : index
    %c0_21 = arith.constant 0 : index
    %c0_22 = arith.constant 0 : index
    %68 = vector.load %arg1[%c2, %c0_21, %c0_22] : memref<3x64x64xbf16, #tpu.memory_space<vmem>>, vector<1x64x64xbf16>
    %69 = vector.shape_cast %68 : vector<1x64x64xbf16> to vector<64x64xbf16>
    %cst_23 = arith.constant dense<0.000000e+00> : vector<16x64xf32>
    %70 = tpu.matmul %67, %69, %cst_23 {dimension_numbers = #tpu.dot_dimension_numbers<[1], [0], [0], [1], [0, 0, 1, 1], [], []>} : vector<16x64xbf16>, vector<64x64xbf16>, vector<16x64xf32> -> vector<16x64xf32>
    %71 = vector.broadcast %9 : vector<1x64xf32> to vector<16x64xf32>
    %72 = arith.addf %70, %71 : vector<16x64xf32>
    %73 = vector.extract_strided_slice %72 {offsets = [0, 0], sizes = [16, 8], strides = [1, 1]} : vector<16x64xf32> to vector<16x8xf32>
    %cst_24 = arith.constant 0.000000e+00 : f32
    %74 = vector.broadcast %cst_24 : f32 to vector<16x8xf32>
    %75 = arith.subf %74, %73 : vector<16x8xf32>
    %76 = math.exp %75 : vector<16x8xf32>
    %cst_25 = arith.constant 1.000000e+00 : f32
    %77 = vector.broadcast %cst_25 : f32 to vector<16x8xf32>
    %78 = arith.addf %77, %76 : vector<16x8xf32>
    %cst_26 = arith.constant 1.000000e+00 : f32
    %79 = vector.broadcast %cst_26 : f32 to vector<16x8xf32>
    %80 = arith.divf %79, %78 : vector<16x8xf32>
    %c0_27 = arith.constant 0 : index
    %c0_28 = arith.constant 0 : index
    %81 = vector.load %arg2[%c0_27, %c0_28] : memref<16x8xf32, #tpu.memory_space<vmem>>, vector<16x8xf32>
    tpu.vector_store %arg2[%c0_27, %c0_28], %80 {strides = array<i32>} : memref<16x8xf32, #tpu.memory_space<vmem>>, vector<16x8xf32>,
    return
  }
}

</mosaic_0001>

<bundles_post_ra>
// kernel: solution_model_forward.1
= control target key start
LH: loop header
LB: loop body
LE: loop exit
PB: predicated region body
PF: predicated region fallthrough
CT: control target
= control target key end

     0   :  { %7 = vsyncpa [#allocation3], 0  ;;  %s609_s0 = inlined_call_operand.hbm [shape: f32[16,32], index: 0, kind: input, shape index: {}]   ;;  %s610_s1 = inlined_call_operand.hbm [shape: bf16[3,64,64], index: 1, kind: input, shape index: {}]   ;;  %s611_s2 = inlined_call_operand.vmem [shape: f32[16,8], index: 2, kind: output, shape index: {}]  }
   0x1   :  { %8 = vsyncpa [#allocation5], 0  ;;  %s519_s9 = smov [#allocation2]   ;;  %s471_s13 = scalar_lea.hbm %s609_s0, 256 }
   0x2   :  { %s14_s10 = sshll.u32 %s519_s9, 4  ;;  %p472_p0 = scmp.ne.s32.totalorder %s609_s0, %s471_s13  ;;  %s15_s10 = int_to_ptr.vmem [resolvable:$true] %s14_s10 }
   0x3   :  { %p475_p1 = scmp.lt.u32.totalorder %s471_s13, %s609_s0 }
   0x5   :  { %p477_p2 = pnand %p475_p1, %p472_p0 }
   0x7   :  { %480 = shalt.err (!%p477_p2)
}
   0x8   :  { %s481_s18 = scalar_lea.vmem %s15_s10, 256  ;;  %p486_p4 = scmp.lt.s32.totalorder %s15_s10, %s15_s10 }
   0x9   :  { %p482_p3 = scmp.ne.s32.totalorder %s15_s10, %s481_s18  ;;  %p487_p5 = scmp.lt.s32.totalorder %s481_s18, %s481_s18 }
   0xb   :  { %p488_p6 = por %p487_p5, %p486_p4 }
   0xd   :  { %p489_p7 = pnand %p488_p6, %p482_p3 }
   0xf   :  { %492 = shalt.err (!%p489_p7)
}
  0x10   :  { %s520_s19 = smov 128   ;;  %s521_s20 = smov 8  }
  0x11   :  { %20 = dma.hbm_to_vmem [thread:$0]  %s609_s0, 256, %s15_s10, [#allocation3], %s520_s19, %s520_s19, %s521_s20  }
  0x12   :  { %s522_s23 = smov [#allocation4]   ;;  %s493_s27 = scalar_lea.hbm %s610_s1, 1536 }
  0x13   :  { %s26_s24 = sshll.u32 %s522_s23, 4  ;;  %p494_p8 = scmp.ne.s32.totalorder %s610_s1, %s493_s27  ;;  %s27_s24 = int_to_ptr.vmem [resolvable:$true] %s26_s24 }
  0x14   :  { %p497_p9 = scmp.lt.u32.totalorder %s493_s27, %s610_s1 }
  0x16   :  { %p499_p10 = pnand %p497_p9, %p494_p8 }
  0x18   :  { %502 = shalt.err (!%p499_p10)
}
  0x19   :  { %s503_s4 = scalar_lea.vmem %s27_s24, 1536  ;;  %p508_p12 = scmp.lt.s32.totalorder %s27_s24, %s27_s24 }
  0x1a   :  { %p504_p11 = scmp.ne.s32.totalorder %s27_s24, %s503_s4  ;;  %p509_p13 = scmp.lt.s32.totalorder %s503_s4, %s503_s4 }
  0x1c   :  { %p510_p0 = por %p509_p13, %p508_p12 }
  0x1e   :  { %p511_p1 = pnand %p510_p0, %p504_p11 }
  0x20   :  { %514 = shalt.err (!%p511_p1)
}
  0x21   :  { %s523_s0 = smov 64   ;;  %s524_s5 = smov 4  }
  0x22   :  { %32 = dma.hbm_to_vmem [thread:$0]  %s610_s1, 1536, %s27_s24, [#allocation5], %s523_s0, %s523_s0, %s524_s5  }
  0x23   :  { %515 = dma.done.wait [#allocation3], 256  }
  0x24   :  { %516 = vsyncadd [#allocation3], 4294967040 }
  0x25   :  { %517 = dma.done.wait [#allocation5], 1536  }
  0x26   :  { %518 = vsyncadd [#allocation5], 4294965760  ;;  %v525_v0 = vmov 0.0   ;;  %vm526_vm0 = vmmov 0   ;;  %v449_v1 = vld [vmem:[#allocation4] sm:$0xff]   ;;  %v450_v2 = vld [vmem:[#allocation4 + $0x8] sm:$0xff]   ;;  %v141_v40 = vlaneseq }
  0x27   :  { %409 = vmatprep.subr.bf16.mxu0 %v525_v0  ;;  %413 = vmatprep.mubr.msk.bf16.mxu0 %vm526_vm0, %v525_v0  ;;  %v46_v3 = vld [vmem:[#allocation2] sm:$0xff]  ;;  %v47_v4 = vld [vmem:[#allocation2 + $0x8] sm:$0xff]  ;;  %vm61_vm1 = vcmask 261120   ;;  %v451_v6 = vld [vmem:[#allocation4 + $0x20] sm:$0xff]   ;;  %vm106_vm2 = vcmask 523264   ;;  %vm374_vm3 = vcmask 64512  }
  0x28   :  { %417 = vmatprep.subr.bf16.mxu1 %v525_v0  ;;  %425 = vmatprep.mubr.msk.bf16.mxu1 %vm526_vm0, %v525_v0  ;;  %v48_v5 = vpack.c.bf16 %v47_v4, %v46_v3  ;;  %v452_v7 = vld [vmem:[#allocation4 + $0x28] sm:$0xff]   ;;  %v453_v8 = vld [vmem:[#allocation4 + $0x30] sm:$0xff]   ;;  %v454_v9 = vld [vmem:[#allocation4 + $0x38] sm:$0xff]   ;;  %v580_v42 = vshrl.u32 %v141_v40, 7 }
  0x29   :  { %410 = vmatpush3.bf16.msra.mxu0 %v449_v1  ;;  %418 = vmatpush3.bf16.msra.mxu1 %v451_v6  ;;  %v44_v41 = vld [vmem:[#allocation4 + $0x10] sm:$0xf]  ;;  %v455_v60 = vld [vmem:[#allocation4 + $0x40] sm:$0xff]   ;;  %v456_v61 = vld [vmem:[#allocation4 + $0x48] sm:$0xff]  }
  0x2a   :  { %411 = vmatprep.subr.bf16.mxu0 %v525_v0  ;;  %419 = vmatprep.subr.bf16.mxu1 %v525_v0  ;;  %v582_v43 = vunpack.c.l.bf16 %v44_v41  ;;  %v143_v44 = vsub.s32 0, %v580_v42  ;;  %v149_v52 = vsub.s32 1, %v580_v42  ;;  %v457_v62 = vld [vmem:[#allocation4 + $0x50] sm:$0xff]   ;;  %v458_v63 = vld [vmem:[#allocation4 + $0x58] sm:$0xff]  }
  0x2d   :  { %412 = vmatpush3.bf16.msra.mxu0 %v450_v2  ;;  %420 = vmatpush3.bf16.msra.mxu1 %v452_v7 }
  0x2e   :  { %429 = vmatprep.subr.bf16.mxu0 %v525_v0  ;;  %421 = vmatprep.subr.bf16.mxu1 %v525_v0 }
  0x30   :  { %414 = vmatmul.mubr.msk.bf16.vlgmr.msra.gmra.mrb[0].mxu0 %vm61_vm1, %v48_v5 }
  0x31   :  { %437 = vmatprep.mubr.msk.bf16.mxu0 %vm526_vm0, %v525_v0  ;;  %422 = vmatpush3.bf16.msra.mxu1 %v453_v8 }
  0x32   :  { %423 = vmatprep.subr.bf16.mxu1 %v525_v0  ;;  %430 = vmatpush3.bf16.msra.mxu0 %v455_v60 }
  0x33   :  { %431 = vmatprep.subr.bf16.mxu0 %v525_v0 }
  0x35   :  { %424 = vmatpush3.bf16.msra.mxu1 %v454_v9 }
  0x36   :  { %432 = vmatpush3.bf16.msra.mxu0 %v456_v61 }
  0x37   :  { %433 = vmatprep.subr.bf16.mxu0 %v525_v0 }
  0x3a   :  { %434 = vmatpush3.bf16.msra.mxu0 %v457_v62 }
  0x3b   :  { %435 = vmatprep.subr.bf16.mxu0 %v525_v0 }
  0x3e   :  { %436 = vmatpush3.bf16.msra.mxu0 %v458_v63 }
 0x103   :  { %v99_v10 = vpop.f32.mrb[0].mxu0 }
 0x104   :  { %v118_v11 = vmul.f32 %v99_v10, %v99_v10  ;;  %v415_v12 = vpop.f32.mrb[1].mxu0  ;;  %v107_v14 = vsel %vm106_vm2, %v99_v10, 0.0 }
 0x105   :  { %v102_v13 = vpop.f32.mrb[2].mxu0 }
 0x106   :  { %v108_v15 = vsel %vm106_vm2, %v102_v13, 0.0  ;;  %v119_v16 = vmul.f32 %v102_v13, %v102_v13  ;;  %v416_v17 = vpop.f32.mrb[3].mxu0  ;;  %v120_v19 = vsel %vm106_vm2, %v118_v11, 0.0 }
 0x107   :  { %v109_v18 = vadd.f32 %v108_v15, %v107_v14 }
 0x108   :  { %v121_v20 = vsel %vm106_vm2, %v119_v16, 0.0 }
 0x109   :  { %v110_v21 = vrot.slane %v109_v18, 4  ;;  %v122_v22 = vadd.f32 %v121_v20, %v120_v19 }
 0x10b   :  { %v111_v23 = vadd.f32 %v110_v21, %v109_v18  ;;  %v123_v24 = vrot.slane %v122_v22, 4 }
 0x10d   :  { %v112_v25 = vrot.slane %v111_v23, 2  ;;  %v124_v26 = vadd.f32 %v123_v24, %v122_v22 }
 0x10f   :  { %v113_v27 = vadd.f32 %v112_v25, %v111_v23  ;;  %v125_v28 = vrot.slane %v124_v26, 2 }
 0x111   :  { %v114_v29 = vrot.slane %v113_v27, 1  ;;  %v126_v30 = vadd.f32 %v125_v28, %v124_v26 }
 0x113   :  { %v115_v31 = vadd.f32 %v114_v29, %v113_v27  ;;  %v127_v32 = vrot.slane %v126_v30, 1 }
 0x115   :  { %v117_v33 = vmul.f32 0.0625, %v115_v31  ;;  %v128_v34 = vadd.f32 %v127_v32, %v126_v30  ;;  %v268_v30 = vsub.s32 2, %v580_v42 }
 0x117   :  { %v129_v35 = vmul.f32 0.0625, %v128_v34  ;;  %v130_v36 = vmul.f32 %v117_v33, %v117_v33 }
 0x119   :  { %v131_v37 = vsub.f32 %v129_v35, %v130_v36 }
 0x11b   :  { %v132_v38 = vmax.f32 %v131_v37, 0.0 }
 0x11d   :  { %v133_v39 = vadd.f32 1e-05, %v132_v38  ;;  %v274_v38 = vsub.s32 3, %v580_v42 }
 0x11f   :  { %459 = vrsqrt.f32 %v133_v39 }
 0x129   :  { %v460_v45 = vpop.eup %459 }
 0x12a   :  { %v135_v46 = vmul.f32 %v460_v45, %v582_v43 }
 0x12c   :  { %v136_v47 = vmul.f32 %v135_v46, %v117_v33  ;;  %v144_v48 = vrot.slane %v135_v46, %v143_v44 }
 0x12e   :  { %v138_v49 = vrot.slane %v136_v47, 7  ;;  %v145_v50 = vmul.f32 %v144_v48, %v99_v10  ;;  %v146_v51 = vmul.f32 %v144_v48, %v102_v13  ;;  %v292_v48 = vsub.s32 4, %v580_v42 }
 0x130   :  { %v140_v53 = vsub.f32 %v582_v43, %v138_v49  ;;  %v293_v49 = vrot.slane %v582_v43, %v292_v48 }
 0x132   :  { %v150_v54 = vrot.slane %v140_v53, %v149_v52 }
 0x134   :  { %v151_v55 = vadd.f32 %v150_v54, %v145_v50  ;;  %v152_v56 = vadd.f32 %v150_v54, %v146_v51 }
 0x136   :  { %v154_v57 = vmax.f32 %v152_v56, 0.0  ;;  %v153_v58 = vmax.f32 %v151_v55, 0.0 }
 0x138   :  { %v155_v59 = vpack.c.bf16 %v154_v57, %v153_v58 }
 0x13a   :  { %426 = vmatmul.mubr.msk.bf16.vlgmr.msra.gmra.mrb[0].mxu1 %vm106_vm2, %v155_v59 }
 0x20d   :  { %v226_v1 = vpop.f32.mrb[0].mxu1 }
 0x20e   :  { %v243_v2 = vmul.f32 %v226_v1, %v226_v1  ;;  %v427_v3 = vpop.f32.mrb[1].mxu1  ;;  %v233_v5 = vsel %vm106_vm2, %v226_v1, 0.0 }
 0x20f   :  { %v229_v4 = vpop.f32.mrb[2].mxu1 }
 0x210   :  { %v234_v6 = vsel %vm106_vm2, %v229_v4, 0.0  ;;  %v244_v7 = vmul.f32 %v229_v4, %v229_v4  ;;  %v428_v8 = vpop.f32.mrb[3].mxu1  ;;  %v245_v10 = vsel %vm106_vm2, %v243_v2, 0.0 }
 0x211   :  { %v235_v9 = vadd.f32 %v234_v6, %v233_v5 }
 0x212   :  { %v246_v11 = vsel %vm106_vm2, %v244_v7, 0.0 }
 0x213   :  { %v236_v12 = vrot.slane %v235_v9, 4  ;;  %v247_v13 = vadd.f32 %v246_v11, %v245_v10 }
 0x215   :  { %v237_v0 = vadd.f32 %v236_v12, %v235_v9  ;;  %v248_v14 = vrot.slane %v247_v13, 4 }
 0x217   :  { %v238_v15 = vrot.slane %v237_v0, 2  ;;  %v249_v16 = vadd.f32 %v248_v14, %v247_v13 }
 0x219   :  { %v239_v17 = vadd.f32 %v238_v15, %v237_v0  ;;  %v250_v18 = vrot.slane %v249_v16, 2 }
 0x21b   :  { %v240_v19 = vrot.slane %v239_v17, 1  ;;  %v251_v20 = vadd.f32 %v250_v18, %v249_v16 }
 0x21d   :  { %v241_v21 = vadd.f32 %v240_v19, %v239_v17  ;;  %v252_v22 = vrot.slane %v251_v20, 1 }
 0x21f   :  { %v242_v23 = vmul.f32 0.0625, %v241_v21  ;;  %v253_v24 = vadd.f32 %v252_v22, %v251_v20 }
 0x221   :  { %v254_v25 = vmul.f32 0.0625, %v253_v24  ;;  %v255_v26 = vmul.f32 %v242_v23, %v242_v23 }
 0x223   :  { %v256_v27 = vsub.f32 %v254_v25, %v255_v26 }
 0x225   :  { %v257_v28 = vmax.f32 %v256_v27, 0.0 }
 0x227   :  { %v258_v29 = vadd.f32 1e-05, %v257_v28 }
 0x229   :  { %461 = vrsqrt.f32 %v258_v29 }
 0x233   :  { %v462_v31 = vpop.eup %461 }
 0x234   :  { %v260_v32 = vmul.f32 %v462_v31, %v582_v43 }
 0x236   :  { %v261_v33 = vmul.f32 %v260_v32, %v242_v23  ;;  %v269_v34 = vrot.slane %v260_v32, %v268_v30 }
 0x238   :  { %v263_v35 = vrot.slane %v261_v33, 7  ;;  %v270_v36 = vmul.f32 %v269_v34, %v226_v1  ;;  %v271_v37 = vmul.f32 %v269_v34, %v229_v4 }
 0x23a   :  { %v265_v39 = vsub.f32 %v582_v43, %v263_v35 }
 0x23c   :  { %v275_v40 = vrot.slane %v265_v39, %v274_v38 }
 0x23e   :  { %v276_v41 = vadd.f32 %v275_v40, %v270_v36  ;;  %v277_v44 = vadd.f32 %v275_v40, %v271_v37 }
 0x240   :  { %v278_v45 = vmax.f32 %v276_v41, 0.0  ;;  %v279_v46 = vmax.f32 %v277_v44, 0.0 }
 0x242   :  { %v280_v47 = vpack.c.bf16 %v279_v46, %v278_v45 }
 0x244   :  { %438 = vmatmul.mubr.msk.bf16.vlgmr.msra.gmra.mrb[4].mxu0 %vm106_vm2, %v280_v47 }
 0x317   :  { %v355_v50 = vpop.f32.mrb[4].mxu0 }
 0x318   :  { %v356_v51 = vadd.f32 %v355_v50, %v293_v49  ;;  %v439_v52 = vpop.f32.mrb[5].mxu0 }
 0x319   :  { %v358_v53 = vpop.f32.mrb[6].mxu0 }
 0x31a   :  { %v362_v54 = vsub.f32 0.0, %v356_v51  ;;  %v359_v55 = vadd.f32 %v358_v53, %v293_v49  ;;  %v440_v56 = vpop.f32.mrb[7].mxu0 }
 0x31c   :  { %v364_v57 = vmul.f32 1.442695, %v362_v54  ;;  %v363_v58 = vsub.f32 0.0, %v359_v55 }
 0x31e   :  { %463 = vpow2.f32 %v364_v57  ;;  %v366_v59 = vmul.f32 1.442695, %v363_v58 }
 0x320   :  { %465 = vpow2.f32 %v366_v59 }
 0x328   :  { %v464_v60 = vpop.eup %463 }
 0x329   :  { %v368_v61 = vadd.f32 1.0, %v464_v60 }
 0x32a   :  { %v466_v62 = vpop.eup %465 }
 0x32b   :  { %467 = vrcp.f32 %v368_v61  ;;  %v369_v63 = vadd.f32 1.0, %v466_v62 }
 0x32d   :  { %469 = vrcp.f32 %v369_v63 }
 0x335   :  { %v468_v42 = vpop.eup %467 }
 0x336   :  { %375 = vst.msk [vmem:[%s611_s2] sm:$0xff] %vm374_vm3, %v468_v42 }
 0x337   :  { %v470_v43 = vpop.eup %469 }
 0x338   :  { %376 = vst.msk [vmem:[%s611_s2 + $0x8] sm:$0xff] %vm374_vm3, %v470_v43 }
 0x339   :  { %381 = vsyncpa [#allocation3], 1 }
 0x33a   :  { %382 = vsyncpa [#allocation5], 1 }

</bundles_post_ra>
